<compile_context>
chip_gen: v7x
topology: tpu7x:2x2x1
jax: 0.10.0
libtpu: 0.0.40
codegen_flags: <defaults>
</compile_context>

<pallas_src>
import functools

import numpy as np
import jax
import jax.numpy as jnp
from jax.experimental import pallas as pl
from jax.experimental.pallas import tpu as pltpu

# ---------------------------- config (synthetic, deterministic) ----------------------------
FEAT_SHAPE = 16      # node feature dim (latent_dim == feat_shape in NeighGen)
NUM_PRED   = 2       # config.num_pred
HIDDEN_DIM = 32      # config.hidden_dim
DROPOUT    = 0.5     # config.dropout  (inference mode -> no-op)
NUM_NODES  = 10      # data.num_nodes
NUM_TAILS  = 4       # len(non_hub_node)


# ---------------------------- fused Pallas kernel ----------------------------
def neighgen_kernel(feat_ref, x_ref, ahat_ref, ahat_t_ref,
                    w1_ref, b1_ref, w2_ref, b2_ref, w3_ref, b3_ref,
                    wg1_ref, bg1_ref, wg2_ref, bg2_ref,
                    gen_out_ref, cls_out_ref,
                    x_new_ref, *, num_pred, num_nodes):
    f32 = jnp.float32
    bf16 = jnp.bfloat16

    # ---- 1) Gen MLP: relu -> relu -> (dropout no-op in eval) -> tanh ----
    # bf16 MXU operands, f32 accumulation; elementwise math stays f32 (v5e-safe).
    h1 = jnp.maximum(
        jnp.dot(feat_ref[...].astype(bf16), w1_ref[...],
                preferred_element_type=f32) + b1_ref[...], 0.0)
    h2 = jnp.maximum(
        jnp.dot(h1.astype(bf16), w2_ref[...],
                preferred_element_type=f32) + b2_ref[...], 0.0)
    gen = jnp.tanh(
        jnp.dot(h2.astype(bf16), w3_ref[...],
                preferred_element_type=f32) + b3_ref[...])
    gen_out_ref[...] = gen                                     # [T, num_pred * F]

    # ---- 2) Add_Neighbor: X_new = vstack(data.x, gen.view(-1, F)) assembled
    #         with direct static row stores into a VMEM scratch (no placement
    #         matmuls, no O(N^2) constants) ----
    t = feat_ref.shape[0]
    feat_dim = x_ref.shape[1]
    x_new_ref[0:num_nodes, :] = x_ref[...]
    for p in range(num_pred):                                  # static, fully unrolled
        for ti in range(t):                                    # (num_pred * T row stores)
            row = num_nodes + ti * num_pred + p
            x_new_ref[row:row + 1, :] = gen[ti:ti + 1, p * feat_dim:(p + 1) * feat_dim]
    x_new = x_new_ref[...]

    # ---- 3) 2-layer GCN classifier with the host-precomputed normalized
    #         adjacency (dropout between layers is a no-op in eval) ----
    ahat = ahat_ref[...]
    xw = jnp.dot(x_new, wg1_ref[...], preferred_element_type=f32)
    h = jnp.maximum(jnp.dot(ahat, xw, preferred_element_type=f32) + bg1_ref[...], 0.0)
    hw = jnp.dot(h, wg2_ref[...], preferred_element_type=f32)  # [N_new, 1]
    # lane-dense [1, N_new] output: z^T[0, j] = sum_k Ahat[j, k] * hw[k, 0]
    z_row = jnp.sum(ahat_t_ref[...] * hw, axis=0, keepdims=True) + bg2_ref[...]
    cls_out_ref[...] = jax.nn.sigmoid(z_row)


# ---------------------------- wrapper (one pallas_call, no grid) ----------------------------
@functools.partial(jax.jit, static_argnames=("num_pred", "num_nodes"))
def neighgen_forward(feat, data_x, ahat, ahat_t, params, *, num_pred, num_nodes):
    t, feat_dim = feat.shape
    n_new = ahat.shape[0]
    pf = num_pred * feat_dim
    d1 = params["gen_w1"].shape[1]
    d2 = params["gen_w2"].shape[1]
    hid = params["gcn_w1"].shape[1]

    args = (feat, data_x, ahat, ahat_t,
            params["gen_w1"], params["gen_b1"],
            params["gen_w2"], params["gen_b2"],
            params["gen_w3"], params["gen_b3"],
            params["gcn_w1"], params["gcn_b1"],
            params["gcn_w2"], params["gcn_b2"])

    flops = 2 * (t * feat_dim * d1 + t * d1 * d2 + t * d2 * pf    # gen MLP
                 + n_new * feat_dim * hid                          # X_new @ Wg1
                 + n_new * n_new * hid                             # Ahat @ XW
                 + n_new * hid                                     # H @ Wg2
                 + n_new * n_new)                                  # Ahat^T-reduce (layer 2)
    transc = t * pf + n_new                                        # tanh, sigmoid
    bytes_accessed = (sum(int(a.size) * a.dtype.itemsize for a in args)
                      + (t * pf + n_new) * 4)

    vmem = pl.BlockSpec(memory_space=pltpu.MemorySpace.VMEM)

    gen_feat, cls_row = pl.pallas_call(
        functools.partial(neighgen_kernel, num_pred=num_pred, num_nodes=num_nodes),
        out_shape=(jax.ShapeDtypeStruct((t, pf), jnp.float32),
                   jax.ShapeDtypeStruct((1, n_new), jnp.float32)),
        in_specs=[vmem] * len(args),
        out_specs=(vmem, vmem),
        scratch_shapes=[pltpu.VMEM((n_new, feat_dim), jnp.float32)],   # X_new
        cost_estimate=pl.CostEstimate(flops=int(flops),
                                      transcendentals=int(transc),
                                      bytes_accessed=int(bytes_accessed)),
    )(*args)

    class_pred = cls_row.reshape(n_new, 1)        # module's output shape [N_new, 1]
    return gen_feat, class_pred


# ---------------------------- host-side constants (numpy, no XLA glue) ----------------------------
def build_static_graph_inputs(num_nodes, edge_index, tails, num_pred):
    """Precompute the normalized adjacency Ahat (and Ahat^T) of the augmented graph.

    Matches the module semantics: generated edges run tail -> generated node,
    A[dst, src] = 1, self loops added, Ahat = D^-1/2 (A + I) D^-1/2 with in-degree.
    """
    tails = np.asarray(tails, dtype=np.int64)
    n_tails = tails.shape[0]
    n_gen = n_tails * num_pred
    n_new = num_nodes + n_gen

    edge_index = np.asarray(edge_index, dtype=np.int64)
    edge_1 = np.repeat(tails, num_pred)                            # src = tail node
    edge_2 = np.arange(num_nodes, num_nodes + n_gen, dtype=np.int64)  # dst = gen node
    src = np.concatenate([edge_index[0], edge_1])
    dst = np.concatenate([edge_index[1], edge_2])

    adj = np.zeros((n_new, n_new), np.float32)
    adj[dst, src] = 1.0                     # duplicate edges clamp to 1 (same as before)
    adj = adj + np.eye(n_new, dtype=np.float32)   # self loops
    deg = adj.sum(axis=1)                   # in-degree, >= 1
    dinv = 1.0 / np.sqrt(deg)
    ahat = dinv[:, None] * adj * dinv[None, :]
    return jnp.asarray(ahat), jnp.asarray(np.ascontiguousarray(ahat.T))


# ---------------------------- parameter init (deterministic) ----------------------------
def init_params(key, feat_shape, num_pred, hidden_dim):
    ks = jax.random.split(key, 10)

    def lin(kw, kb, fan_in, fan_out, w_dtype=jnp.float32):
        bound = 1.0 / np.sqrt(fan_in)
        w = jax.random.uniform(kw, (fan_in, fan_out), jnp.float32, -bound, bound)
        b = jax.random.uniform(kb, (1, fan_out), jnp.float32, -bound, bound)
        return w.astype(w_dtype), b

    p = {}
    # Gen-MLP weights stored as bf16 (native MXU path, halves the dominant DMA).
    p["gen_w1"], p["gen_b1"] = lin(ks[0], ks[1], feat_shape, 512, jnp.bfloat16)
    p["gen_w2"], p["gen_b2"] = lin(ks[2], ks[3], 512, 256, jnp.bfloat16)
    p["gen_w3"], p["gen_b3"] = lin(ks[4], ks[5], 256, num_pred * feat_shape, jnp.bfloat16)
    # GCN weights are tiny; keep f32.
    p["gcn_w1"], p["gcn_b1"] = lin(ks[6], ks[7], feat_shape, hidden_dim)
    p["gcn_w2"], p["gcn_b2"] = lin(ks[8], ks[9], hidden_dim, 1)
    return p


# ---------------------------- main ----------------------------
if __name__ == "__main__":
    key = jax.random.PRNGKey(0)
    k_param, k_x, k_feat = jax.random.split(key, 3)

    params = init_params(k_param, FEAT_SHAPE, NUM_PRED, HIDDEN_DIM)

    # synthetic graph: bidirectional ring over NUM_NODES nodes
    src = np.arange(NUM_NODES, dtype=np.int64)
    dst = (src + 1) % NUM_NODES
    edge_index = np.vstack([np.hstack([src, dst]), np.hstack([dst, src])])

    tails = [6, 7, 8, 9][:NUM_TAILS]                         # non_hub_node
    data_x = jax.random.normal(k_x, (NUM_NODES, FEAT_SHAPE), jnp.float32)
    feat = jax.random.normal(k_feat, (NUM_TAILS, FEAT_SHAPE), jnp.float32)

    ahat, ahat_t = build_static_graph_inputs(NUM_NODES, edge_index, tails, NUM_PRED)

    gen_feat, class_pred = neighgen_forward(feat, data_x, ahat, ahat_t, params,
                                            num_pred=NUM_PRED, num_nodes=NUM_NODES)
    jax.block_until_ready((gen_feat, class_pred))

    n_new = NUM_NODES + NUM_TAILS * NUM_PRED
    assert gen_feat.shape == (NUM_TAILS, NUM_PRED * FEAT_SHAPE)
    assert class_pred.shape == (n_new, 1)
    assert bool(jnp.all(jnp.isfinite(gen_feat))) and bool(jnp.all(jnp.isfinite(class_pred)))
    assert bool(jnp.all(jnp.abs(gen_feat) <= 1.0))                       # tanh range
    assert bool(jnp.all((class_pred >= 0.0) & (class_pred <= 1.0)))      # sigmoid range
    print("KERNEL_OK")
</pallas_src>

<mosaic_0001>
module attributes {stable_mosaic.version = 11 : i64} {
  func.func @neighgen_kernel(%arg0: memref<4x16xf32, #tpu.memory_space<vmem>>, %arg1: memref<10x16xf32, #tpu.memory_space<vmem>>, %arg2: memref<18x18xf32, #tpu.memory_space<vmem>>, %arg3: memref<18x18xf32, #tpu.memory_space<vmem>>, %arg4: memref<16x512xbf16, #tpu.memory_space<vmem>>, %arg5: memref<1x512xf32, #tpu.memory_space<vmem>>, %arg6: memref<512x256xbf16, #tpu.memory_space<vmem>>, %arg7: memref<1x256xf32, #tpu.memory_space<vmem>>, %arg8: memref<256x32xbf16, #tpu.memory_space<vmem>>, %arg9: memref<1x32xf32, #tpu.memory_space<vmem>>, %arg10: memref<16x32xf32, #tpu.memory_space<vmem>>, %arg11: memref<1x32xf32, #tpu.memory_space<vmem>>, %arg12: memref<32x1xf32, #tpu.memory_space<vmem>>, %arg13: memref<1x1xf32, #tpu.memory_space<vmem>>, %arg14: memref<4x32xf32, #tpu.memory_space<vmem>>, %arg15: memref<1x18xf32, #tpu.memory_space<vmem>>, %arg16: memref<18x16xf32, #tpu.memory_space<vmem>>) attributes {dimension_semantics = [], scalar_prefetch = 0 : i64, scratch_operands = 1 : i64, tpu.core_type = #tpu.core_type<tc>} {
    %c0 = arith.constant 0 : index
    %c0_0 = arith.constant 0 : index
    %0 = vector.load %arg0[%c0, %c0_0] : memref<4x16xf32, #tpu.memory_space<vmem>>, vector<4x16xf32>
    %1 = arith.truncf %0 : vector<4x16xf32> to vector<4x16xbf16>
    %c0_1 = arith.constant 0 : index
    %c0_2 = arith.constant 0 : index
    %2 = vector.load %arg4[%c0_1, %c0_2] : memref<16x512xbf16, #tpu.memory_space<vmem>>, vector<16x512xbf16>
    %cst = arith.constant dense<0.000000e+00> : vector<4x512xf32>
    %3 = tpu.matmul %1, %2, %cst {dimension_numbers = #tpu.dot_dimension_numbers<[1], [0], [0], [1], [0, 0, 1, 1], [], []>} : vector<4x16xbf16>, vector<16x512xbf16>, vector<4x512xf32> -> vector<4x512xf32>
    %c0_3 = arith.constant 0 : index
    %c0_4 = arith.constant 0 : index
    %4 = vector.load %arg5[%c0_3, %c0_4] : memref<1x512xf32, #tpu.memory_space<vmem>>, vector<1x512xf32>
    %5 = vector.broadcast %4 : vector<1x512xf32> to vector<4x512xf32>
    %6 = arith.addf %3, %5 : vector<4x512xf32>
    %cst_5 = arith.constant 0.000000e+00 : f32
    %7 = vector.broadcast %cst_5 : f32 to vector<4x512xf32>
    %8 = arith.maximumf %6, %7 : vector<4x512xf32>
    %9 = arith.truncf %8 : vector<4x512xf32> to vector<4x512xbf16>
    %c0_6 = arith.constant 0 : index
    %c0_7 = arith.constant 0 : index
    %10 = vector.load %arg6[%c0_6, %c0_7] : memref<512x256xbf16, #tpu.memory_space<vmem>>, vector<512x256xbf16>
    %cst_8 = arith.constant dense<0.000000e+00> : vector<4x256xf32>
    %11 = tpu.matmul %9, %10, %cst_8 {dimension_numbers = #tpu.dot_dimension_numbers<[1], [0], [0], [1], [0, 0, 1, 1], [], []>} : vector<4x512xbf16>, vector<512x256xbf16>, vector<4x256xf32> -> vector<4x256xf32>
    %c0_9 = arith.constant 0 : index
    %c0_10 = arith.constant 0 : index
    %12 = vector.load %arg7[%c0_9, %c0_10] : memref<1x256xf32, #tpu.memory_space<vmem>>, vector<1x256xf32>
    %13 = vector.broadcast %12 : vector<1x256xf32> to vector<4x256xf32>
    %14 = arith.addf %11, %13 : vector<4x256xf32>
    %cst_11 = arith.constant 0.000000e+00 : f32
    %15 = vector.broadcast %cst_11 : f32 to vector<4x256xf32>
    %16 = arith.maximumf %14, %15 : vector<4x256xf32>
    %17 = arith.truncf %16 : vector<4x256xf32> to vector<4x256xbf16>
    %c0_12 = arith.constant 0 : index
    %c0_13 = arith.constant 0 : index
    %18 = vector.load %arg8[%c0_12, %c0_13] : memref<256x32xbf16, #tpu.memory_space<vmem>>, vector<256x32xbf16>
    %cst_14 = arith.constant dense<0.000000e+00> : vector<4x32xf32>
    %19 = tpu.matmul %17, %18, %cst_14 {dimension_numbers = #tpu.dot_dimension_numbers<[1], [0], [0], [1], [0, 0, 1, 1], [], []>} : vector<4x256xbf16>, vector<256x32xbf16>, vector<4x32xf32> -> vector<4x32xf32>
    %c0_15 = arith.constant 0 : index
    %c0_16 = arith.constant 0 : index
    %20 = vector.load %arg9[%c0_15, %c0_16] : memref<1x32xf32, #tpu.memory_space<vmem>>, vector<1x32xf32>
    %21 = vector.broadcast %20 : vector<1x32xf32> to vector<4x32xf32>
    %22 = arith.addf %19, %21 : vector<4x32xf32>
    %23 = math.tanh %22 : vector<4x32xf32>
    %c0_17 = arith.constant 0 : index
    %c0_18 = arith.constant 0 : index
    %24 = vector.load %arg14[%c0_17, %c0_18] : memref<4x32xf32, #tpu.memory_space<vmem>>, vector<4x32xf32>
    tpu.vector_store %arg14[%c0_17, %c0_18], %23 {strides = array<i32>} : memref<4x32xf32, #tpu.memory_space<vmem>>, vector<4x32xf32>,
    %c0_19 = arith.constant 0 : index
    %c0_20 = arith.constant 0 : index
    %25 = vector.load %arg1[%c0_19, %c0_20] : memref<10x16xf32, #tpu.memory_space<vmem>>, vector<10x16xf32>
    %c0_21 = arith.constant 0 : index
    %c0_22 = arith.constant 0 : index
    %26 = vector.load %arg16[%c0_21, %c0_22] : memref<18x16xf32, #tpu.memory_space<vmem>>, vector<10x16xf32>
    tpu.vector_store %arg16[%c0_21, %c0_22], %25 {strides = array<i32>} : memref<18x16xf32, #tpu.memory_space<vmem>>, vector<10x16xf32>,
    %27 = vector.extract_strided_slice %23 {offsets = [0, 0], sizes = [1, 16], strides = [1, 1]} : vector<4x32xf32> to vector<1x16xf32>
    %c10 = arith.constant 10 : index
    %c0_23 = arith.constant 0 : index
    %28 = vector.load %arg16[%c10, %c0_23] : memref<18x16xf32, #tpu.memory_space<vmem>>, vector<1x16xf32>
    tpu.vector_store %arg16[%c10, %c0_23], %27 {strides = array<i32>} : memref<18x16xf32, #tpu.memory_space<vmem>>, vector<1x16xf32>,
    %29 = vector.extract_strided_slice %23 {offsets = [1, 0], sizes = [1, 16], strides = [1, 1]} : vector<4x32xf32> to vector<1x16xf32>
    %c12 = arith.constant 12 : index
    %c0_24 = arith.constant 0 : index
    %30 = vector.load %arg16[%c12, %c0_24] : memref<18x16xf32, #tpu.memory_space<vmem>>, vector<1x16xf32>
    tpu.vector_store %arg16[%c12, %c0_24], %29 {strides = array<i32>} : memref<18x16xf32, #tpu.memory_space<vmem>>, vector<1x16xf32>,
    %31 = vector.extract_strided_slice %23 {offsets = [2, 0], sizes = [1, 16], strides = [1, 1]} : vector<4x32xf32> to vector<1x16xf32>
    %c14 = arith.constant 14 : index
    %c0_25 = arith.constant 0 : index
    %32 = vector.load %arg16[%c14, %c0_25] : memref<18x16xf32, #tpu.memory_space<vmem>>, vector<1x16xf32>
    tpu.vector_store %arg16[%c14, %c0_25], %31 {strides = array<i32>} : memref<18x16xf32, #tpu.memory_space<vmem>>, vector<1x16xf32>,
    %33 = vector.extract_strided_slice %23 {offsets = [3, 0], sizes = [1, 16], strides = [1, 1]} : vector<4x32xf32> to vector<1x16xf32>
    %c16 = arith.constant 16 : index
    %c0_26 = arith.constant 0 : index
    %34 = vector.load %arg16[%c16, %c0_26] : memref<18x16xf32, #tpu.memory_space<vmem>>, vector<1x16xf32>
    tpu.vector_store %arg16[%c16, %c0_26], %33 {strides = array<i32>} : memref<18x16xf32, #tpu.memory_space<vmem>>, vector<1x16xf32>,
    %35 = vector.extract_strided_slice %23 {offsets = [0, 16], sizes = [1, 16], strides = [1, 1]} : vector<4x32xf32> to vector<1x16xf32>
    %c11 = arith.constant 11 : index
    %c0_27 = arith.constant 0 : index
    %36 = vector.load %arg16[%c11, %c0_27] : memref<18x16xf32, #tpu.memory_space<vmem>>, vector<1x16xf32>
    tpu.vector_store %arg16[%c11, %c0_27], %35 {strides = array<i32>} : memref<18x16xf32, #tpu.memory_space<vmem>>, vector<1x16xf32>,
    %37 = vector.extract_strided_slice %23 {offsets = [1, 16], sizes = [1, 16], strides = [1, 1]} : vector<4x32xf32> to vector<1x16xf32>
    %c13 = arith.constant 13 : index
    %c0_28 = arith.constant 0 : index
    %38 = vector.load %arg16[%c13, %c0_28] : memref<18x16xf32, #tpu.memory_space<vmem>>, vector<1x16xf32>
    tpu.vector_store %arg16[%c13, %c0_28], %37 {strides = array<i32>} : memref<18x16xf32, #tpu.memory_space<vmem>>, vector<1x16xf32>,
    %39 = vector.extract_strided_slice %23 {offsets = [2, 16], sizes = [1, 16], strides = [1, 1]} : vector<4x32xf32> to vector<1x16xf32>
    %c15 = arith.constant 15 : index
    %c0_29 = arith.constant 0 : index
    %40 = vector.load %arg16[%c15, %c0_29] : memref<18x16xf32, #tpu.memory_space<vmem>>, vector<1x16xf32>
    tpu.vector_store %arg16[%c15, %c0_29], %39 {strides = array<i32>} : memref<18x16xf32, #tpu.memory_space<vmem>>, vector<1x16xf32>,
    %41 = vector.extract_strided_slice %23 {offsets = [3, 16], sizes = [1, 16], strides = [1, 1]} : vector<4x32xf32> to vector<1x16xf32>
    %c17 = arith.constant 17 : index
    %c0_30 = arith.constant 0 : index
    %42 = vector.load %arg16[%c17, %c0_30] : memref<18x16xf32, #tpu.memory_space<vmem>>, vector<1x16xf32>
    tpu.vector_store %arg16[%c17, %c0_30], %41 {strides = array<i32>} : memref<18x16xf32, #tpu.memory_space<vmem>>, vector<1x16xf32>,
    %c0_31 = arith.constant 0 : index
    %c0_32 = arith.constant 0 : index
    %43 = vector.load %arg16[%c0_31, %c0_32] : memref<18x16xf32, #tpu.memory_space<vmem>>, vector<18x16xf32>
    %c0_33 = arith.constant 0 : index
    %c0_34 = arith.constant 0 : index
    %44 = vector.load %arg2[%c0_33, %c0_34] : memref<18x18xf32, #tpu.memory_space<vmem>>, vector<18x18xf32>
    %c0_35 = arith.constant 0 : index
    %c0_36 = arith.constant 0 : index
    %45 = vector.load %arg10[%c0_35, %c0_36] : memref<16x32xf32, #tpu.memory_space<vmem>>, vector<16x32xf32>
    %cst_37 = arith.constant dense<0.000000e+00> : vector<18x32xf32>
    %46 = tpu.matmul %43, %45, %cst_37 {dimension_numbers = #tpu.dot_dimension_numbers<[1], [0], [0], [1], [0, 0, 1, 1], [], []>} : vector<18x16xf32>, vector<16x32xf32>, vector<18x32xf32> -> vector<18x32xf32>
    %cst_38 = arith.constant dense<0.000000e+00> : vector<18x32xf32>
    %47 = tpu.matmul %44, %46, %cst_38 {dimension_numbers = #tpu.dot_dimension_numbers<[1], [0], [0], [1], [0, 0, 1, 1], [], []>} : vector<18x18xf32>, vector<18x32xf32>, vector<18x32xf32> -> vector<18x32xf32>
    %c0_39 = arith.constant 0 : index
    %c0_40 = arith.constant 0 : index
    %48 = vector.load %arg11[%c0_39, %c0_40] : memref<1x32xf32, #tpu.memory_space<vmem>>, vector<1x32xf32>
    %49 = vector.broadcast %48 : vector<1x32xf32> to vector<18x32xf32>
    %50 = arith.addf %47, %49 : vector<18x32xf32>
    %cst_41 = arith.constant 0.000000e+00 : f32
    %51 = vector.broadcast %cst_41 : f32 to vector<18x32xf32>
    %52 = arith.maximumf %50, %51 : vector<18x32xf32>
    %c0_42 = arith.constant 0 : index
    %c0_43 = arith.constant 0 : index
    %53 = vector.load %arg12[%c0_42, %c0_43] : memref<32x1xf32, #tpu.memory_space<vmem>>, vector<32x1xf32>
    %cst_44 = arith.constant dense<0.000000e+00> : vector<18x1xf32>
    %54 = tpu.matmul %52, %53, %cst_44 {dimension_numbers = #tpu.dot_dimension_numbers<[1], [0], [0], [1], [0, 0, 1, 1], [], []>} : vector<18x32xf32>, vector<32x1xf32>, vector<18x1xf32> -> vector<18x1xf32>
    %c0_45 = arith.constant 0 : index
    %c0_46 = arith.constant 0 : index
    %55 = vector.load %arg3[%c0_45, %c0_46] : memref<18x18xf32, #tpu.memory_space<vmem>>, vector<18x18xf32>
    %56 = vector.broadcast %54 : vector<18x1xf32> to vector<18x18xf32>
    %57 = arith.mulf %55, %56 : vector<18x18xf32>
    %cst_47 = arith.constant dense<0.000000e+00> : vector<18xf32>
    %58 = vector.multi_reduction <add>, %57, %cst_47 [0] : vector<18x18xf32> to vector<18xf32>
    %59 = vector.shape_cast %58 : vector<18xf32> to vector<1x18xf32>
    %c0_48 = arith.constant 0 : index
    %c0_49 = arith.constant 0 : index
    %60 = vector.load %arg13[%c0_48, %c0_49] : memref<1x1xf32, #tpu.memory_space<vmem>>, vector<1x1xf32>
    %61 = vector.broadcast %60 : vector<1x1xf32> to vector<1x18xf32>
    %62 = arith.addf %59, %61 : vector<1x18xf32>
    %63 = arith.negf %62 : vector<1x18xf32>
    %64 = math.exp %63 : vector<1x18xf32>
    %cst_50 = arith.constant 1.000000e+00 : f32
    %65 = vector.broadcast %cst_50 : f32 to vector<1x18xf32>
    %66 = arith.addf %65, %64 : vector<1x18xf32>
    %67 = arith.divf %65, %66 : vector<1x18xf32>
    %c0_51 = arith.constant 0 : index
    %c0_52 = arith.constant 0 : index
    %68 = vector.load %arg15[%c0_51, %c0_52] : memref<1x18xf32, #tpu.memory_space<vmem>>, vector<1x18xf32>
    tpu.vector_store %arg15[%c0_51, %c0_52], %67 {strides = array<i32>} : memref<1x18xf32, #tpu.memory_space<vmem>>, vector<1x18xf32>,
    return
  }
}

</mosaic_0001>

<bundles_post_ra>
// kernel: neighgen_forward.1
= control target key start
LH: loop header
LB: loop body
LE: loop exit
PB: predicated region body
PF: predicated region fallthrough
CT: control target
= control target key end

     0   :  { %s1981_s0 = inlined_call_operand.vmem [shape: f32[4,16], index: 0, kind: input, shape index: {}]   ;;  %s1982_s1 = inlined_call_operand.vmem [shape: f32[10,16], index: 1, kind: input, shape index: {}]   ;;  %s1983_s2 = inlined_call_operand.vmem [shape: f32[18,18], index: 2, kind: input, shape index: {}]   ;;  %s1984_s3 = inlined_call_operand.vmem [shape: f32[18,18], index: 3, kind: input, shape index: {}]   ;;  %s1985_s4 = inlined_call_operand.vmem [shape: bf16[16,512], index: 4, kind: input, shape index: {}]   ;;  %s1986_s5 = inlined_call_operand.vmem [shape: f32[1,512], index: 5, kind: input, shape index: {}]   ;;  %s1987_s6 = inlined_call_operand.hbm [shape: bf16[512,256], index: 6, kind: input, shape index: {}]   ;;  %s1988_s7 = inlined_call_operand.vmem [shape: f32[1,256], index: 7, kind: input, shape index: {}]   ;;  %s1989_s8 = inlined_call_operand.vmem [shape: bf16[256,32], index: 8, kind: input, shape index: {}]   ;;  %s1990_s9 = inlined_call_operand.vmem [shape: f32[1,32], index: 9, kind: input, shape index: {}]   ;;  %s1991_s10 = inlined_call_operand.vmem [shape: f32[16,32], index: 10, kind: input, shape index: {}]   ;;  %s1992_s11 = inlined_call_operand.vmem [shape: f32[1,32], index: 11, kind: input, shape index: {}]   ;;  %s1993_s12 = inlined_call_operand.vmem [shape: f32[32,1], index: 12, kind: input, shape index: {}]   ;;  %s1994_s13 = inlined_call_operand.<no memory space> [shape: f32[1,1], index: 13, kind: input, shape index: {}]   ;;  %s1995_s14 = inlined_call_operand.hbm [shape: f32[4,32], index: 14, kind: output, shape index: {0}]   ;;  %s1996_s15 = inlined_call_operand.hbm [shape: f32[1,18], index: 15, kind: output, shape index: {1}]  }
   0x1   :  { %v21_v0 = vstv %s1994_s13 }
   0x2   :  { %22 = vst [vmem:[#allocation3] sm:$0x1] %v21_v0 }
   0x3   :  { %23 = vsyncpa [#allocation5], 0 }
   0x4   :  { %24 = vsyncpa [#allocation6], 0 }
   0x5   :  { %25 = vsyncpa [#allocation9], 0  ;;  %s1677_s20 = smov [#allocation4]   ;;  %s1605_s24 = scalar_lea.hbm %s1987_s6, 8192 }
   0x6   :  { %s43_s21 = sshll.u32 %s1677_s20, 4  ;;  %p1606_p0 = scmp.ne.s32.totalorder %s1987_s6, %s1605_s24  ;;  %s44_s21 = int_to_ptr.vmem [resolvable:$true] %s43_s21 }
   0x7   :  { %p1609_p1 = scmp.lt.u32.totalorder %s1605_s24, %s1987_s6 }
   0x9   :  { %p1611_p2 = pnand %p1609_p1, %p1606_p0 }
   0xb   :  { %1614 = shalt.err (!%p1611_p2)
}
   0xc   :  { %s1615_s13 = scalar_lea.vmem %s44_s21, 8192  ;;  %p1620_p4 = scmp.lt.s32.totalorder %s44_s21, %s44_s21 }
   0xd   :  { %p1616_p3 = scmp.ne.s32.totalorder %s44_s21, %s1615_s13  ;;  %p1621_p5 = scmp.lt.s32.totalorder %s1615_s13, %s1615_s13 }
   0xf   :  { %p1622_p6 = por %p1621_p5, %p1620_p4 }
  0x11   :  { %p1623_p7 = pnand %p1622_p6, %p1616_p3 }
  0x13   :  { %1626 = shalt.err (!%p1623_p7)
}
  0x14   :  { %s1678_s29 = smov 128   ;;  %s1679_s30 = smov 8  }
  0x15   :  { %49 = dma.hbm_to_vmem [thread:$0]  %s1987_s6, 8192, %s44_s21, [#allocation5], %s1678_s29, %s1678_s29, %s1679_s30  }
  0x16   :  { %1671 = dma.done.wait [#allocation5], 8192  }
  0x17   :  { %1672 = vsyncadd [#allocation5], 4294959104  ;;  %v1680_v1 = vmov 0   ;;  %v1481_v2 = vld [vmem:[%s1985_s4 + $0x4] ss:$16 sps:$4 sm:$0xff]   ;;  %vm116_vm0 = vcmask 130048   ;;  %v76_v54 = vlaneseq }
  0x18   :  { %152 = vmatprep.mubr.bf16.mxu1 %v1680_v1  ;;  %1480 = vset.pattern.permute.xlu1 %v1680_v1  ;;  %v1483_v3 = vld [vmem:[%s1985_s4] ss:$16 sps:$4 sm:$0xff]   ;;  %v1484_v7 = vld [vmem:[%s1985_s4 + $0x8] ss:$16 sps:$4 sm:$0xff]   ;;  %v1486_v8 = vld [vmem:[%s1985_s4 + $0xc] ss:$16 sps:$4 sm:$0xff]  }
  0x19   :  { %1479 = vset.pattern.permute.xlu0 %v1680_v1  ;;  %v68_v4 = vld [vmem:[%s1981_s0] sm:$0xf]  ;;  %120 = vmatprep.subr.bf16.mxu1 %v1481_v2  ;;  %v1490_v11 = vld [vmem:[#allocation4 + $0x14] ss:$8 sps:$4 sm:$0xff]   ;;  %v1492_v12 = vld [vmem:[#allocation4 + $0x10] ss:$8 sps:$4 sm:$0xff]  }
  0x1a   :  { %v870_v5 = vld [vmem:[%s1982_s1] sm:$0xff]  ;;  %v69_v6 = vpack.c.bf16 %v68_v4, %v68_v4  ;;  %121 = vmatpush1.bf16.msra.mxu1 %v1483_v3  ;;  %v1496_v15 = vld [vmem:[#allocation4 + $0x34] ss:$8 sps:$4 sm:$0xff]   ;;  %v1498_v16 = vld [vmem:[#allocation4 + $0x30] ss:$8 sps:$4 sm:$0xff]   ;;  %v1839_v55 = vshrl.u32 %v76_v54, 7 }
  0x1b   :  { %872 = vst.msk [vmem:[#allocation2] sm:$0xff] %vm116_vm0, %v870_v5  ;;  %v1487_v9 = vld [vmem:[#allocation4 + $0x4] ss:$8 sps:$4 sm:$0xff]   ;;  %v1489_v10 = vld [vmem:[#allocation4] ss:$8 sps:$4 sm:$0xff]   ;;  %161 = vmatprep.subr.bf16.mxu1 %v1486_v8  ;;  %v1587_v46 = vld [vmem:[%s1989_s8 + $0x50] sm:$0xff]  }
  0x1c   :  { %606 = vmatprep.subr.bf16.mxu0 %v1487_v9  ;;  %v1493_v13 = vld [vmem:[#allocation4 + $0x24] ss:$8 sps:$4 sm:$0xff]   ;;  %v1495_v14 = vld [vmem:[#allocation4 + $0x20] ss:$8 sps:$4 sm:$0xff]   ;;  %v1502_v19 = vld [vmem:[#allocation4 + $0x54] ss:$8 sps:$4 sm:$0xff]  }
  0x1d   :  { %1271 = vmatmul.mubr.msk.bf16.vlgmr.msra.gmra.mrb[0].mxu1 %vm116_vm0, %v69_v6  ;;  %607 = vmatpush1.bf16.msra.mxu0 %v1489_v10  ;;  %v1499_v17 = vld [vmem:[#allocation4 + $0x44] ss:$8 sps:$4 sm:$0xff]   ;;  %v1501_v18 = vld [vmem:[#allocation4 + $0x40] ss:$8 sps:$4 sm:$0xff]   ;;  %v1504_v20 = vld [vmem:[#allocation4 + $0x50] ss:$8 sps:$4 sm:$0xff]  }
  0x1e   :  { %162 = vmatpush1.bf16.msra.mxu1 %v1484_v7  ;;  %193 = vmatprep.mubr.bf16.mxu1 %v1680_v1  ;;  %v1505_v21 = vld [vmem:[#allocation4 + $0x64] ss:$8 sps:$4 sm:$0xff]   ;;  %v1507_v22 = vld [vmem:[#allocation4 + $0x60] ss:$8 sps:$4 sm:$0xff]   ;;  %v1508_v23 = vld [vmem:[#allocation4 + $0x74] ss:$8 sps:$4 sm:$0xff]  }
  0x1f   :  { %608 = vmatprep.subr.bf16.mxu0 %v1490_v11  ;;  %v1510_v24 = vld [vmem:[#allocation4 + $0x70] ss:$8 sps:$4 sm:$0xff]   ;;  %v1511_v25 = vld [vmem:[#allocation4 + $0x84] ss:$8 sps:$4 sm:$0xff]   ;;  %v1513_v26 = vld [vmem:[#allocation4 + $0x80] ss:$8 sps:$4 sm:$0xff]  }
  0x20   :  { %v1514_v27 = vld [vmem:[#allocation4 + $0x94] ss:$8 sps:$4 sm:$0xff]   ;;  %v1516_v28 = vld [vmem:[#allocation4 + $0x90] ss:$8 sps:$4 sm:$0xff]   ;;  %v1517_v29 = vld [vmem:[#allocation4 + $0xa4] ss:$8 sps:$4 sm:$0xff]  }
  0x21   :  { %609 = vmatpush1.bf16.msra.mxu0 %v1492_v12  ;;  %v1519_v30 = vld [vmem:[#allocation4 + $0xa0] ss:$8 sps:$4 sm:$0xff]   ;;  %v1520_v31 = vld [vmem:[#allocation4 + $0xb4] ss:$8 sps:$4 sm:$0xff]   ;;  %v1522_v32 = vld [vmem:[#allocation4 + $0xb0] ss:$8 sps:$4 sm:$0xff]  }
  0x22   :  { %610 = vmatprep.subr.bf16.mxu0 %v1493_v13  ;;  %v1523_v33 = vld [vmem:[#allocation4 + $0xc4] ss:$8 sps:$4 sm:$0xff]   ;;  %v1525_v34 = vld [vmem:[#allocation4 + $0xc0] ss:$8 sps:$4 sm:$0xff]   ;;  %v1526_v35 = vld [vmem:[#allocation4 + $0xd4] ss:$8 sps:$4 sm:$0xff]  }
  0x23   :  { %v1528_v36 = vld [vmem:[#allocation4 + $0xd0] ss:$8 sps:$4 sm:$0xff]   ;;  %v1529_v37 = vld [vmem:[#allocation4 + $0xe4] ss:$8 sps:$4 sm:$0xff]   ;;  %v1531_v38 = vld [vmem:[#allocation4 + $0xe0] ss:$8 sps:$4 sm:$0xff]  }
  0x24   :  { %v1532_v39 = vld [vmem:[#allocation4 + $0xf4] ss:$8 sps:$4 sm:$0xff]   ;;  %v1534_v40 = vld [vmem:[#allocation4 + $0xf0] ss:$8 sps:$4 sm:$0xff]   ;;  %v1537_v41 = vld [vmem:[#allocation4 + $0x104] ss:$8 sps:$4 sm:$0xff]  }
  0x25   :  { %1272 = vmatmul.mubr.msk.bf16.vlgmr.msra.gmra.mrb[4].mxu1 %vm116_vm0, %v69_v6  ;;  %611 = vmatpush1.bf16.msra.mxu0 %v1495_v14  ;;  %v1583_v42 = vld [vmem:[%s1989_s8 + $0x40] sm:$0xff]   ;;  %v1585_v44 = vld [vmem:[%s1989_s8 + $0x48] sm:$0xff]   ;;  %v1588_v47 = vld [vmem:[%s1989_s8 + $0x10] sm:$0xff]   ;;  %v1842_v56 = vsub.s32 0, %v1839_v55  ;;  %v82_v58 = vsub.s32 1, %v1839_v55  ;;  %v90_v2 = vsub.s32 3, %v1839_v55 }
  0x26   :  { %612 = vmatprep.subr.bf16.mxu0 %v1496_v15  ;;  %v1584_v43 = vld [vmem:[%s1989_s8] sm:$0xff]   ;;  %1366 = vmatprep.subr.bf16.mxu1 %v1583_v42  ;;  %v1586_v45 = vld [vmem:[%s1989_s8 + $0x8] sm:$0xff]   ;;  %v1589_v48 = vld [vmem:[%s1989_s8 + $0x58] sm:$0xff]   ;;  %vm873_vm1 = vcmask 123904   ;;  %vm1682_vm2 = vmmov 0   ;;  %vm875_vm3 = vcmask 122880  }
  0x27   :  { %1367 = vmatpush3.bf16.msra.mxu1 %v1584_v43  ;;  %v1590_v49 = vld [vmem:[%s1989_s8 + $0x18] sm:$0xff]   ;;  %v1591_v50 = vld [vmem:[%s1989_s8 + $0x60] sm:$0xff]   ;;  %v1593_v52 = vld [vmem:[%s1989_s8 + $0x68] sm:$0xff]   ;;  %vm877_vm4 = vcmask 123905   ;;  %vm879_vm5 = vcmask 124930   ;;  %vm881_vm6 = vcmask 125955  }
  0x28   :  { %1368 = vmatprep.subr.bf16.mxu1 %v1585_v44  ;;  %v1592_v51 = vld [vmem:[%s1989_s8 + $0x20] sm:$0xff]   ;;  %v1594_v53 = vld [vmem:[%s1989_s8 + $0x28] sm:$0xff]   ;;  %v1597_v54 = vld [vmem:[%s1989_s8 + $0x78] sm:$0xff]   ;;  %vm868_vm7 = vcmask 257024   ;;  %vm1005_vm8 = vcmask 1041408   ;;  %vm995_vm9 = vcmask 146432  }
  0x29   :  { %613 = vmatpush1.bf16.msra.mxu0 %v1498_v16  ;;  %v1847_v57 = vld [vmem:[%s1986_s5] sm:$0xf]  ;;  %v1540_v10 = vld [vmem:[#allocation4 + $0x114] ss:$8 sps:$4 sm:$0xff]   ;;  %v1538_v13 = vld [vmem:[#allocation4 + $0x110] ss:$8 sps:$4 sm:$0xff]  }
  0x2a   :  { %614 = vmatprep.subr.bf16.mxu0 %v1499_v17  ;;  %v79_v59 = vrot.slane %v1847_v57, %v1842_v56  ;;  %v83_v60 = vrot.slane %v1847_v57, %v82_v58  ;;  %v1535_v7 = vld [vmem:[#allocation4 + $0x100] ss:$8 sps:$4 sm:$0xff]   ;;  %v91_v8 = vrot.slane %v1847_v57, %v90_v2  ;;  %v1543_v16 = vld [vmem:[#allocation4 + $0x124] ss:$8 sps:$4 sm:$0xff]   ;;  %v1576_v42 = vld [vmem:[#allocation4 + $0x1d4] ss:$8 sps:$4 sm:$0xff]  }
  0x2b   :  { %1369 = vmatpush3.bf16.msra.mxu1 %v1586_v45  ;;  %v1574_v43 = vld [vmem:[#allocation4 + $0x1d0] ss:$8 sps:$4 sm:$0xff]   ;;  %v1579_v45 = vld [vmem:[#allocation4 + $0x1e4] ss:$8 sps:$4 sm:$0xff]   ;;  %vm1096_vm10 = vcmask 261120  }
  0x2c   :  { %1370 = vmatprep.subr.bf16.mxu1 %v1587_v46  ;;  %v1577_v46 = vld [vmem:[#allocation4 + $0x1e0] ss:$8 sps:$4 sm:$0xff]  }
  0x2d   :  { %615 = vmatpush1.bf16.msra.mxu0 %v1501_v18 }
  0x2e   :  { %616 = vmatprep.subr.bf16.mxu0 %v1502_v19  ;;  %v1541_v19 = vld [vmem:[#allocation4 + $0x120] ss:$8 sps:$4 sm:$0xff]  }
  0x2f   :  { %1371 = vmatpush3.bf16.msra.mxu1 %v1588_v47 }
  0x30   :  { %1372 = vmatprep.subr.bf16.mxu1 %v1589_v48  ;;  %v1582_v48 = vld [vmem:[#allocation4 + $0x1f4] ss:$8 sps:$4 sm:$0xff]  }
  0x31   :  { %617 = vmatpush1.bf16.msra.mxu0 %v1504_v20 }
  0x32   :  { %618 = vmatprep.subr.bf16.mxu0 %v1505_v21  ;;  %v1546_v21 = vld [vmem:[#allocation4 + $0x134] ss:$8 sps:$4 sm:$0xff]  }
  0x33   :  { %1373 = vmatpush3.bf16.msra.mxu1 %v1590_v49  ;;  %v1580_v49 = vld [vmem:[#allocation4 + $0x1f0] ss:$8 sps:$4 sm:$0xff]  }
  0x34   :  { %1374 = vmatprep.subr.bf16.mxu1 %v1591_v50 }
  0x35   :  { %619 = vmatpush1.bf16.msra.mxu0 %v1507_v22  ;;  %v1544_v22 = vld [vmem:[#allocation4 + $0x130] ss:$8 sps:$4 sm:$0xff]  }
  0x36   :  { %620 = vmatprep.subr.bf16.mxu0 %v1508_v23  ;;  %v1549_v23 = vld [vmem:[#allocation4 + $0x144] ss:$8 sps:$4 sm:$0xff]  }
  0x37   :  { %1375 = vmatpush3.bf16.msra.mxu1 %v1592_v51 }
  0x38   :  { %1376 = vmatprep.subr.bf16.mxu1 %v1593_v52  ;;  %v1595_v52 = vld [vmem:[%s1989_s8 + $0x70] sm:$0xff]  }
  0x39   :  { %621 = vmatpush1.bf16.msra.mxu0 %v1510_v24  ;;  %v1547_v24 = vld [vmem:[#allocation4 + $0x140] ss:$8 sps:$4 sm:$0xff]  }
  0x3a   :  { %622 = vmatprep.subr.bf16.mxu0 %v1511_v25  ;;  %v1552_v25 = vld [vmem:[#allocation4 + $0x154] ss:$8 sps:$4 sm:$0xff]  }
  0x3b   :  { %1377 = vmatpush3.bf16.msra.mxu1 %v1594_v53  ;;  %v1596_v53 = vld [vmem:[%s1989_s8 + $0x30] sm:$0xff]  }
  0x3c   :  { %1378 = vmatprep.subr.bf16.mxu1 %v1595_v52 }
  0x3d   :  { %623 = vmatpush1.bf16.msra.mxu0 %v1513_v26  ;;  %v1550_v26 = vld [vmem:[#allocation4 + $0x150] ss:$8 sps:$4 sm:$0xff]  }
  0x3e   :  { %624 = vmatprep.subr.bf16.mxu0 %v1514_v27  ;;  %v1555_v27 = vld [vmem:[#allocation4 + $0x164] ss:$8 sps:$4 sm:$0xff]  }
  0x3f   :  { %1379 = vmatpush3.bf16.msra.mxu1 %v1596_v53 }
  0x40   :  { %1380 = vmatprep.subr.bf16.mxu1 %v1597_v54 }
  0x41   :  { %625 = vmatpush1.bf16.msra.mxu0 %v1516_v28  ;;  %v1553_v28 = vld [vmem:[#allocation4 + $0x160] ss:$8 sps:$4 sm:$0xff]  }
  0x42   :  { %626 = vmatprep.subr.bf16.mxu0 %v1517_v29  ;;  %v1558_v29 = vld [vmem:[#allocation4 + $0x174] ss:$8 sps:$4 sm:$0xff]  }
  0x45   :  { %627 = vmatpush1.bf16.msra.mxu0 %v1519_v30  ;;  %v1556_v30 = vld [vmem:[#allocation4 + $0x170] ss:$8 sps:$4 sm:$0xff]  }
  0x46   :  { %628 = vmatprep.subr.bf16.mxu0 %v1520_v31  ;;  %v1561_v31 = vld [vmem:[#allocation4 + $0x184] ss:$8 sps:$4 sm:$0xff]  }
  0x49   :  { %629 = vmatpush1.bf16.msra.mxu0 %v1522_v32  ;;  %v1559_v32 = vld [vmem:[#allocation4 + $0x180] ss:$8 sps:$4 sm:$0xff]  }
  0x4a   :  { %630 = vmatprep.subr.bf16.mxu0 %v1523_v33  ;;  %v1564_v33 = vld [vmem:[#allocation4 + $0x194] ss:$8 sps:$4 sm:$0xff]  }
  0x4d   :  { %631 = vmatpush1.bf16.msra.mxu0 %v1525_v34  ;;  %v1562_v34 = vld [vmem:[#allocation4 + $0x190] ss:$8 sps:$4 sm:$0xff]  }
  0x4e   :  { %632 = vmatprep.subr.bf16.mxu0 %v1526_v35  ;;  %v1567_v35 = vld [vmem:[#allocation4 + $0x1a4] ss:$8 sps:$4 sm:$0xff]  }
  0x51   :  { %633 = vmatpush1.bf16.msra.mxu0 %v1528_v36  ;;  %v1565_v36 = vld [vmem:[#allocation4 + $0x1a0] ss:$8 sps:$4 sm:$0xff]  }
  0x52   :  { %634 = vmatprep.subr.bf16.mxu0 %v1529_v37  ;;  %v1570_v37 = vld [vmem:[#allocation4 + $0x1b4] ss:$8 sps:$4 sm:$0xff]  }
  0x55   :  { %635 = vmatpush1.bf16.msra.mxu0 %v1531_v38  ;;  %v1568_v38 = vld [vmem:[#allocation4 + $0x1b0] ss:$8 sps:$4 sm:$0xff]  }
  0x56   :  { %636 = vmatprep.subr.bf16.mxu0 %v1532_v39  ;;  %v1573_v39 = vld [vmem:[#allocation4 + $0x1c4] ss:$8 sps:$4 sm:$0xff]  }
  0x59   :  { %637 = vmatpush1.bf16.msra.mxu0 %v1534_v40  ;;  %v1571_v40 = vld [vmem:[#allocation4 + $0x1c0] ss:$8 sps:$4 sm:$0xff]  }
  0x5a   :  { %647 = vmatprep.subr.bf16.mxu0 %v1537_v41  ;;  %v86_v41 = vsub.s32 2, %v1839_v55  ;;  %v1337_v55 = vld [vmem:[%s1990_s9] ss:$0 sm:$0xff] }
  0x5c   :  { %v87_v44 = vrot.slane %v1847_v57, %v86_v41  ;;  %v1598_v57 = vld [vmem:[%s1989_s8 + $0x38] sm:$0xff]  }
  0x5d   :  { %1381 = vmatpush3.bf16.msra.mxu1 %v1598_v57 }
  0xf0   :  { %v154_v61 = vpop.f32.mrb[0].mxu1 }
  0xf1   :  { %v155_v62 = vadd.f32 %v154_v61, %v79_v59  ;;  %v156_v63 = vpop.f32.mrb[1].mxu1  ;;  %v274_v59 = vld [vmem:[%s1988_s7] sm:$0x3] }
  0xf2   :  { %v157_v0 = vadd.f32 %v156_v63, %v83_v60  ;;  %v158_v1 = vpop.f32.mrb[2].mxu1  ;;  %v279_v60 = vrot.slane %v274_v59, %v1842_v56  ;;  %v283_v61 = vrot.slane %v274_v59, %v82_v58 }
  0xf3   :  { %v202_v3 = vmax.f32 %v155_v62, 0.0  ;;  %v159_v4 = vpop.f32.mrb[3].mxu1 }
  0xf4   :  { %v203_v5 = vmax.f32 %v157_v0, 0.0 }
  0xf5   :  { %v206_v9 = vpack.c.bf16 %v202_v3, %v202_v3 }
  0xf6   :  { %v207_v6 = vpack.c.bf16 %v203_v5, %v203_v5 }
  0xf8   :  { %638 = vmatprep.mubr.bf16.mxu0 %v207_v6  ;;  %v1857_v11 = vpop.f32.mrb[4].mxu1 }
  0xf9   :  { %639 = vmatmul.mubr.bf16.vlgmr.msra.gmra.mrb[0].mxu0 %v206_v9  ;;  %v197_v12 = vpop.f32.mrb[5].mxu1  ;;  %v196_v47 = vadd.f32 %v1857_v11, %v87_v44  ;;  %v898_v11 = vld [vmem:[%s1991_s10 + $0x8] sm:$0xff] }
  0xfa   :  { %648 = vmatpush1.bf16.msra.mxu0 %v1535_v7  ;;  %v198_v14 = vadd.f32 %v197_v12, %v91_v8  ;;  %v199_v15 = vpop.f32.mrb[6].mxu1  ;;  %v1681_v8 = vmov 0.0|0.0  }
  0xfb   :  { %649 = vmatprep.subr.bf16.mxu0 %v1540_v10  ;;  %v200_v17 = vpop.f32.mrb[7].mxu1  ;;  %v204_v50 = vmax.f32 %v196_v47, 0.0  ;;  %1451 = vmatprep.subr.bf16.mxu1 %v1681_v8  ;;  %v897_v10 = vld [vmem:[%s1991_s10] sm:$0xff] }
  0xfc   :  { %v205_v18 = vmax.f32 %v198_v14, 0.0  ;;  %v1452_v14 = vpack.c.bf16 %v898_v11, %v897_v10 }
  0xfd   :  { %v208_v51 = vpack.c.bf16 %v204_v50, %v204_v50 }
  0xfe   :  { %650 = vmatpush1.bf16.msra.mxu0 %v1538_v13  ;;  %v209_v20 = vpack.c.bf16 %v205_v18, %v205_v18  ;;  %v891_v18 = vld [vmem:[#allocation2] sm:$0xff] }
  0xff   :  { %651 = vmatprep.subr.bf16.mxu0 %v1543_v16  ;;  %v871_v16 = vld [vmem:[%s1982_s1 + $0x8] sm:$0x3]  ;;  %s1684_s1 = smov 112  }
 0x100   :  { %679 = vmatprep.mubr.bf16.mxu0 %v209_v20  ;;  %874 = vst.msk [vmem:[#allocation2 + $0x8] sm:$0x3] %vm873_vm1, %v871_v16 }
 0x102   :  { %652 = vmatpush1.bf16.msra.mxu0 %v1541_v19  ;;  %v1683_v19 = vmov 0.0  }
 0x103   :  { %653 = vmatprep.subr.bf16.mxu0 %v1546_v21 }
 0x106   :  { %654 = vmatpush1.bf16.msra.mxu0 %v1544_v22 }
 0x107   :  { %655 = vmatprep.subr.bf16.mxu0 %v1549_v23 }
 0x10a   :  { %656 = vmatpush1.bf16.msra.mxu0 %v1547_v24 }
 0x10b   :  { %657 = vmatprep.subr.bf16.mxu0 %v1552_v25 }
 0x10e   :  { %658 = vmatpush1.bf16.msra.mxu0 %v1550_v26 }
 0x10f   :  { %659 = vmatprep.subr.bf16.mxu0 %v1555_v27 }
 0x112   :  { %660 = vmatpush1.bf16.msra.mxu0 %v1553_v28 }
 0x113   :  { %661 = vmatprep.subr.bf16.mxu0 %v1558_v29  ;;  %v1092_v29 = vld [vmem:[%s1993_s12] sm:$0xff] }
 0x116   :  { %662 = vmatpush1.bf16.msra.mxu0 %v1556_v30  ;;  %v1093_v30 = vld [vmem:[%s1993_s12 + $0x8] sm:$0xff] }
 0x117   :  { %663 = vmatprep.subr.bf16.mxu0 %v1561_v31 }
 0x11a   :  { %664 = vmatpush1.bf16.msra.mxu0 %v1559_v32 }
 0x11b   :  { %665 = vmatprep.subr.bf16.mxu0 %v1564_v33  ;;  %v894_v33 = vld [vmem:[%s1983_s2] sm:$0xff] }
 0x11e   :  { %666 = vmatpush1.bf16.msra.mxu0 %v1562_v34  ;;  %v1458_v34 = vpack.c.bf16 %v1093_v30, %v1092_v29 }
 0x11f   :  { %667 = vmatprep.subr.bf16.mxu0 %v1567_v35  ;;  %v895_v35 = vld [vmem:[%s1983_s2 + $0x8] sm:$0xff] }
 0x122   :  { %668 = vmatpush1.bf16.msra.mxu0 %v1565_v36  ;;  %v896_v36 = vld [vmem:[%s1983_s2 + $0x10] sm:$0x3]  ;;  %s1685_s2 = smov [#allocation7]  }
 0x123   :  { %669 = vmatprep.subr.bf16.mxu0 %v1570_v37  ;;  %v1094_v37 = vld [vmem:[%s1993_s12 + $0x10] sm:$0xff] }
 0x126   :  { %670 = vmatpush1.bf16.msra.mxu0 %v1568_v38  ;;  %v1095_v38 = vld [vmem:[%s1993_s12 + $0x18] sm:$0xff] }
 0x127   :  { %671 = vmatprep.subr.bf16.mxu0 %v1573_v39  ;;  %v1461_v39 = vpack.c.bf16 %v1095_v38, %v1094_v37 }
 0x12a   :  { %672 = vmatpush1.bf16.msra.mxu0 %v1571_v40  ;;  %v1357_v40 = vld [vmem:[%s1992_s11] ss:$0 sm:$0xff]  ;;  %s1244_s11 = sshll.u32 %s1685_s2, 4  ;;  %s1245_s11 = int_to_ptr.vmem [resolvable:$true] %s1244_s11 }
 0x12b   :  { %673 = vmatprep.subr.bf16.mxu0 %v1576_v42  ;;  %s1627_s12 = scalar_lea.vmem %s1245_s11, 64  ;;  %p1632_p9 = scmp.lt.s32.totalorder %s1245_s11, %s1245_s11 }
 0x12c   :  { %p1628_p8 = scmp.ne.s32.totalorder %s1245_s11, %s1627_s12  ;;  %p1633_p10 = scmp.lt.s32.totalorder %s1627_s12, %s1627_s12 }
 0x12e   :  { %674 = vmatpush1.bf16.msra.mxu0 %v1574_v43  ;;  %p1634_p11 = por %p1633_p10, %p1632_p9 }
 0x12f   :  { %675 = vmatprep.subr.bf16.mxu0 %v1579_v45 }
 0x130   :  { %p1635_p12 = pnand %p1634_p11, %p1628_p8 }
 0x132   :  { %676 = vmatpush1.bf16.msra.mxu0 %v1577_v46 }
 0x133   :  { %677 = vmatprep.subr.bf16.mxu0 %v1582_v48 }
 0x136   :  { %678 = vmatpush1.bf16.msra.mxu0 %v1580_v49 }
 0x139   :  { %680 = vmatmul.mubr.bf16.vlgmr.msra.gmra.mrb[0].mxu0 %v208_v51 }
 0x20c   :  { %v681_v62 = vpop.f32.mrb[0].mxu0 }
 0x20d   :  { %v1463_v63 = vadd.f32 %v681_v62, %v279_v60  ;;  %v683_v0 = vpop.f32.mrb[1].mxu0  ;;  %v1219_v62 = vld [vmem:[#allocation3] sm:$0x1] }
 0x20e   :  { %v1464_v1 = vadd.f32 %v683_v0, %v283_v61  ;;  %v685_v2 = vpop.f32.mrb[2].mxu0 }
 0x20f   :  { %v688_v3 = vmax.f32 %v1463_v63, 0.0  ;;  %v686_v4 = vpop.f32.mrb[3].mxu0 }
 0x210   :  { %v689_v5 = vmax.f32 %v1464_v1, 0.0 }
 0x211   :  { %v690_v7 = vpack.c.bf16 %v688_v3, %v688_v3 }
 0x212   :  { %v691_v6 = vpack.c.bf16 %v689_v5, %v689_v5 }
 0x214   :  { %859 = vmatprep.mubr.bf16.mxu1 %v691_v6 }
 0x215   :  { %860 = vmatmul.mubr.bf16.vlgmr.msra.gmra.mrb[8].mxu1 %v690_v7 }
 0x216   :  { %1453 = vmatpush3.bf16.msra.mxu1 %v1452_v14  ;;  %1410 = vmatprep.mubr.msk.f32.mxu1 %vm1682_vm2, %v1683_v19 }
 0x217   :  { %1454 = vmatprep.subr.bf16.mxu1 %v1681_v8 }
 0x21d   :  { %1411 = vmatmul.mubr.msk.f32.vlgmr.msra.gmra.mrb[12].mxu1 %vm116_vm0, %v891_v18 }
 0x21e   :  { %1413 = vmatprep.mubr.msk.f32.mxu1 %vm1682_vm2, %v1683_v19 }
 0x2e8   :  { %v1382_v9 = vpop.f32.mrb[8].mxu1 }
 0x2e9   :  { %v1383_v58 = vpop.f32.mrb[9].mxu1 }
 0x2ea   :  { %v1384_v12 = vadd.f32 %v1383_v58, %v1382_v9  ;;  %v1385_v13 = vpop.f32.mrb[10].mxu1 }
 0x2eb   :  { %v1386_v15 = vpop.f32.mrb[11].mxu1 }
 0x2ec   :  { %v862_v17 = vadd.f32 %v1384_v12, %v1337_v55 }
 0x2ee   :  { %1599 = vtanh.f32 %v862_v17 }
 0x2f0   :  { %v974_v24 = vpop.f32.mrb[12].mxu1 }
 0x2f1   :  { %v1412_v25 = vpop.f32.mrb[13].mxu1 }
 0x2f8   :  { %v1600_v20 = vpop.eup %1599 }
 0x2f9   :  { %884 = vrot.lane.b32.xlu0 %v1600_v20, %s1684_s1  ;;  %876 = vst.msk [vmem:[#allocation2 + $0xa] sm:$0x1] %vm875_vm3, %v1600_v20 }
 0x2fa   :  { %878 = vst.msk [vmem:[#allocation2 + $0xb] sm:$0x2] %vm877_vm4, %v1600_v20 }
 0x2fb   :  { %880 = vst.msk [vmem:[#allocation2 + $0xc] sm:$0x4] %vm879_vm5, %v1600_v20 }
 0x2fc   :  { %882 = vst.msk [vmem:[#allocation2 + $0xd] sm:$0x8] %vm881_vm6, %v1600_v20 }
 0x2fd   :  { %869 = vst.msk [vmem:[#allocation7] sm:$0xf] %vm868_vm7, %v1600_v20 }
 0x36b   :  { %v885_v21 = vpop.permute.xlu0 %884 }
 0x36c   :  { %887 = vst.msk [vmem:[#allocation2 + $0xb] sm:$0x1] %vm875_vm3, %v885_v21 }
 0x36d   :  { %888 = vst.msk [vmem:[#allocation2 + $0xc] sm:$0x2] %vm877_vm4, %v885_v21 }
 0x36e   :  { %889 = vst.msk [vmem:[#allocation2 + $0xd] sm:$0x4] %vm879_vm5, %v885_v21 }
 0x36f   :  { %890 = vst.msk [vmem:[#allocation2 + $0xe] sm:$0x8] %vm881_vm6, %v885_v21 }
 0x375   :  { %v892_v22 = vld [vmem:[#allocation2 + $0x8] sm:$0xff] }
 0x376   :  { %1414 = vmatmul.mubr.msk.f32.gmra.mrb[14].mxu1 %vm116_vm0, %v892_v22  ;;  %v893_v23 = vld [vmem:[#allocation2 + $0x10] sm:$0x3] }
 0x377   :  { %1416 = vmatprep.mubr.msk.f32.mxu1 %vm1682_vm2, %v1683_v19 }
 0x37a   :  { %1417 = vmatmul.mubr.msk.f32.gmra.mrb[16].mxu1 %vm116_vm0, %v893_v23 }
 0x37b   :  { %1425 = vmatprep.mubr.msk.f32.mxu1 %vm1682_vm2, %v1683_v19 }
 0x449   :  { %v979_v26 = vpop.f32.mrb[14].mxu1 }
 0x44a   :  { %v1455_v27 = vpack.c.bf16 %v979_v26, %v974_v24  ;;  %v1415_v28 = vpop.f32.mrb[15].mxu1 }
 0x44c   :  { %1456 = vmatpush3.bf16.msra.mxu1 %v1455_v27 }
 0x44d   :  { %v984_v31 = vpop.f32.mrb[16].mxu1  ;;  %1423 = vmatprep.subr.mxu1 %v1683_v19 }
 0x44e   :  { %v1418_v32 = vpop.f32.mrb[17].mxu1 }
 0x450   :  { %1424 = vmatpush3.msk.msra.mxu1 %vm1005_vm8, %v984_v31 }
 0x451   :  { %1426 = vmatmul.mubr.msk.f32.vlgmr.msra.gmra.mrb[18].mxu1 %vm995_vm9, %v894_v33  ;;  %1457 = vmatprep.subr.bf16.mxu1 %v1681_v8 }
 0x452   :  { %1428 = vmatprep.mubr.msk.f32.mxu1 %vm1682_vm2, %v1683_v19  ;;  %1459 = vmatpush3.bf16.msra.mxu1 %v1458_v34 }
 0x453   :  { %1460 = vmatprep.subr.bf16.mxu1 %v1681_v8 }
 0x455   :  { %1429 = vmatmul.mubr.msk.f32.gmra.mrb[20].mxu1 %vm995_vm9, %v895_v35 }
 0x456   :  { %1431 = vmatprep.mubr.msk.f32.mxu1 %vm1682_vm2, %v1683_v19  ;;  %1462 = vmatpush3.bf16.msra.mxu1 %v1461_v39 }
 0x459   :  { %1432 = vmatmul.mubr.msk.f32.gmra.mrb[22].mxu1 %vm995_vm9, %v896_v36 }
 0x45a   :  { %1442 = vmatprep.mubr.msk.f32.mxu1 %vm1682_vm2, %v1683_v19 }
 0x524   :  { %v1075_v41 = vpop.f32.mrb[18].mxu1 }
 0x525   :  { %v1076_v42 = vadd.f32 %v1357_v40, %v1075_v41  ;;  %v1427_v43 = vpop.f32.mrb[19].mxu1 }
 0x527   :  { %v1089_v44 = vmax.f32 %v1076_v42, 0.0 }
 0x528   :  { %v1080_v45 = vpop.f32.mrb[20].mxu1 }
 0x529   :  { %v1081_v46 = vadd.f32 %v1357_v40, %v1080_v45  ;;  %1443 = vmatmul.mubr.msk.f32.vlgmr.msra.gmra.mrb[24].mxu1 %vm1096_vm10, %v1089_v44  ;;  %v1430_v47 = vpop.f32.mrb[21].mxu1 }
 0x52a   :  { %1445 = vmatprep.mubr.msk.f32.mxu1 %vm1682_vm2, %v1683_v19 }
 0x52b   :  { %v1090_v48 = vmax.f32 %v1081_v46, 0.0 }
 0x52c   :  { %v1085_v49 = vpop.f32.mrb[22].mxu1 }
 0x52d   :  { %v1086_v50 = vadd.f32 %v1357_v40, %v1085_v49  ;;  %1446 = vmatmul.mubr.msk.f32.gmra.mrb[26].mxu1 %vm1096_vm10, %v1090_v48  ;;  %v1433_v51 = vpop.f32.mrb[23].mxu1 }
 0x52e   :  { %1448 = vmatprep.mubr.msk.f32.mxu1 %vm1682_vm2, %v1683_v19 }
 0x52f   :  { %v1091_v52 = vmax.f32 %v1086_v50, 0.0 }
 0x531   :  { %1449 = vmatmul.mubr.msk.f32.gmra.mrb[28].mxu1 %vm1096_vm10, %v1091_v52 }
 0x5fc   :  { %v1172_v53 = vpop.f32.mrb[24].mxu1 }
 0x5fd   :  { %v1444_v54 = vpop.f32.mrb[25].mxu1  ;;  %1191 = vperm.xlu0 %1479, %v1172_v53  }
 0x600   :  { %v1177_v57 = vpop.f32.mrb[26].mxu1 }
 0x601   :  { %1196 = vperm.xlu1 %1480, %v1177_v57   ;;  %v1447_v59 = vpop.f32.mrb[27].mxu1 }
 0x604   :  { %v1182_v60 = vpop.f32.mrb[28].mxu1 }
 0x605   :  { %1201 = vperm.xlu1 %1480, %v1182_v60   ;;  %v1450_v61 = vpop.f32.mrb[29].mxu1 }
 0x609   :  { %1222 = vperm.xlu1 %1480, %v1219_v62  }
 0x60a   :  { %1638 = shalt.err (!%p1635_p12)
}
 0x60b   :  { %s1639_s26 = scalar_lea.hbm %s1995_s14, 64 }
 0x60c   :  { %p1640_p13 = scmp.ne.s32.totalorder %s1995_s14, %s1639_s26  ;;  %p1643_p0 = scmp.lt.u32.totalorder %s1639_s26, %s1995_s14 }
 0x60e   :  { %p1645_p1 = pnand %p1643_p0, %p1640_p13 }
 0x610   :  { %1648 = shalt.err (!%p1645_p1)
}
 0x611   :  { %1247 = dma.vmem_to_hbm [thread:$0]  %s1245_s11, 64, %s1995_s14, [#allocation6]   ;;  %v1187_v63 = vld [vmem:[%s1984_s3 + $0x8] sm:$0xff]  ;;  %v1186_v0 = vld [vmem:[%s1984_s3] sm:$0xff]  ;;  %v1188_v5 = vld [vmem:[%s1984_s3 + $0x10] sm:$0x3] }
 0x612   :  { %vm1210_vm11 = vcmask 140288   ;;  %s1686_s3 = smov [#allocation8]   ;;  %vm1236_vm12 = vcmask 139264  }
 0x613   :  { %s1254_s14 = sshll.u32 %s1686_s3, 4  ;;  %s1255_s14 = int_to_ptr.vmem [resolvable:$true] %s1254_s14 }
 0x614   :  { %s1649_s5 = scalar_lea.vmem %s1255_s14, 16  ;;  %s1653_s18 = scalar_lea.vmem %s1255_s14, 32 }
 0x615   :  { %p1650_p2 = scmp.ne.s32.totalorder %s1255_s14, %s1649_s5  ;;  %p1654_p3 = scmp.lt.s32.totalorder %s1255_s14, %s1255_s14 }
 0x616   :  { %p1655_p4 = scmp.lt.s32.totalorder %s1653_s18, %s1649_s5 }
 0x618   :  { %p1656_p5 = por %p1655_p4, %p1654_p3 }
 0x61a   :  { %p1657_p6 = pnand %p1656_p5, %p1650_p2 }
 0x67c   :  { %v1192_v1 = vpop.permute.xlu0 %1191 }
 0x67d   :  { %v1204_v4 = vmul.f32 %v1192_v1, %v1186_v0 }
 0x67f   :  { %v1207_v8 = vsel %vm995_vm9, %v1204_v4, 0.0 }
 0x680   :  { %v1197_v2 = vpop.permute.xlu1 %1196 }
 0x681   :  { %v1205_v3 = vmul.f32 %v1197_v2, %v1187_v63 }
 0x683   :  { %v1208_v6 = vsel %vm995_vm9, %v1205_v3, 0.0 }
 0x684   :  { %v1202_v7 = vpop.permute.xlu1 %1201  ;;  %v1209_v55 = vadd.f32 %v1208_v6, %v1207_v8 }
 0x685   :  { %v1206_v9 = vmul.f32 %v1202_v7, %v1188_v5 }
 0x687   :  { %v1211_v58 = vsel %vm1210_vm11, %v1206_v9, 0.0 }
 0x688   :  { %v1212_v10 = vadd.f32 %v1211_v58, %v1209_v55  ;;  %v1223_v15 = vpop.permute.xlu1 %1222 }
 0x689   :  { %v1228_v18 = vrot.slane %v1223_v15, %v1842_v56 }
 0x68a   :  { %v1213_v11 = vrot.slane %v1212_v10, 4 }
 0x68c   :  { %v1214_v12 = vadd.f32 %v1213_v11, %v1212_v10 }
 0x68e   :  { %v1215_v13 = vrot.slane %v1214_v12, 2 }
 0x690   :  { %v1216_v14 = vadd.f32 %v1215_v13, %v1214_v12 }
 0x692   :  { %v1217_v16 = vrot.slane %v1216_v14, 1 }
 0x694   :  { %v1218_v17 = vadd.f32 %v1217_v16, %v1216_v14 }
 0x696   :  { %v1229_v19 = vadd.f32 %v1228_v18, %v1218_v17 }
 0x698   :  { %v1365_v20 = vmul.f32 -1.442695, %v1229_v19 }
 0x69a   :  { %1601 = vpow2.f32 %v1365_v20 }
 0x6a4   :  { %v1602_v21 = vpop.eup %1601 }
 0x6a5   :  { %v1233_v22 = vadd.f32 1.0, %v1602_v21 }
 0x6a7   :  { %1603 = vrcp.f32 %v1233_v22 }
 0x6b1   :  { %v1604_v23 = vpop.eup %1603 }
 0x6b2   :  { %1237 = vst.msk [vmem:[#allocation8] sm:$0x1] %vm1236_vm12, %v1604_v23 }
 0x6b3   :  { %1660 = shalt.err (!%p1657_p6)
}
 0x6b4   :  { %s1661_s22 = scalar_lea.hbm %s1996_s15, 16 }
 0x6b5   :  { %p1662_p7 = scmp.ne.s32.totalorder %s1996_s15, %s1661_s22  ;;  %p1665_p8 = scmp.lt.u32.totalorder %s1661_s22, %s1996_s15 }
 0x6b7   :  { %p1667_p9 = pnand %p1665_p8, %p1662_p7 }
 0x6b9   :  { %1670 = shalt.err (!%p1667_p9)
}
 0x6ba   :  { %1257 = dma.vmem_to_hbm [thread:$0]  %s1255_s14, 16, %s1996_s15, [#allocation9]  }
 0x6bb   :  { %1673 = dma.done.wait [#allocation6], 64  }
 0x6bc   :  { %1674 = vsyncadd [#allocation6], 4294967232 }
 0x6bd   :  { %1675 = dma.done.wait [#allocation9], 16  }
 0x6be   :  { %1676 = vsyncadd [#allocation9], 4294967280 }
 0x6bf   :  { %1264 = vsyncpa [#allocation5], 1 }
 0x6c0   :  { %1265 = vsyncpa [#allocation6], 1 }
 0x6c1   :  { %1266 = vsyncpa [#allocation9], 1 }

</bundles_post_ra>
